<compile_context>
chip_gen: v7x
topology: tpu7x:2x2x1
jax: 0.10.0
libtpu: 0.0.40
codegen_flags: <defaults>
</compile_context>

<pallas_src>
import functools
from math import exp

import jax
import jax.numpy as jnp
import numpy as np
from jax.experimental import pallas as pl
from jax.experimental.pallas import tpu as pltpu

WINDOW_SIZE = 11
SIGMA = 1.5
C1 = 0.01 ** 2
C2 = 0.03 ** 2


def _gaussian_1d(window_size: int, sigma: float) -> np.ndarray:
    """Mirrors gaussian() from the PyTorch module (normalized, float32)."""
    g = np.array(
        [exp(-((x - window_size // 2) ** 2) / float(2 * sigma ** 2)) for x in range(window_size)],
        dtype=np.float32,
    )
    return (g / g.sum()).astype(np.float32)


def _gaussian_window_2d(window_size: int, sigma: float) -> np.ndarray:
    g = _gaussian_1d(window_size, sigma)
    return np.outer(g, g).astype(np.float32)


def _band_matrix(size: int, g1d: np.ndarray) -> np.ndarray:
    """Banded matrix B with B[r, c] = g[c - r + P] for |c - r| <= P, else 0.

    Right-multiplying image rows by B is exactly a 1-D zero-padded "same"
    convolution with the 1-D gaussian (B is symmetric since g is symmetric).
    """
    k = g1d.shape[0]
    p = k // 2
    m = np.zeros((size, size), np.float32)
    for r in range(size):
        for c in range(max(0, r - p), min(size, r + p + 1)):
            m[r, c] = g1d[c - r + p]
    return m


def _conv_same(x_bf16, bw, bh):
    """Separable 11x11 gaussian 'same' conv as two flattened MXU matmuls.

    x_bf16: (M, H, W) bf16.  bw: (W, W) bf16, bh: (H, H) bf16 banded tap
    matrices (symmetric).  Returns (M, H, W) float32.
    """
    m, h, w = x_bf16.shape
    # W pass: one large flattened matmul; band matrix stays staged in the MXU.
    t = jnp.dot(x_bf16.reshape(m * h, w), bw, preferred_element_type=jnp.float32)
    # H pass: swap the two minor dims (XLU transpose, otherwise idle), then the
    # same flattened matmul (bh symmetric -> no matrix transpose needed).
    t = jnp.swapaxes(t.reshape(m, h, w), 1, 2)                       # (M, W, H) f32
    u = jnp.dot(t.astype(jnp.bfloat16).reshape(m * w, h), bh,
                preferred_element_type=jnp.float32)
    return jnp.swapaxes(u.reshape(m, w, h), 1, 2)                    # (M, H, W) f32


def _label_stats_kernel(labels_ref, bw_ref, bh_ref, stats_ref, *, n, c, h, w):
    """One-shot label statistics: stats[0] = mu2, stats[1] = sigma2_sq."""
    b = n * c
    target_b = labels_ref[...].astype(jnp.float32).reshape(b, h, w)
    slab = jnp.concatenate([target_b, target_b * target_b], axis=0)  # (2B, H, W)
    conv = _conv_same(slab.astype(jnp.bfloat16), bw_ref[...], bh_ref[...])
    mu2 = conv[:b]
    stats_ref[0] = mu2
    stats_ref[1] = conv[b:] - mu2 * mu2                              # sigma2_sq


def _bas_loss_kernel(preds_ref, labels_ref, stats_ref, bw_ref, bh_ref, out_ref,
                     *, n, c, h, w):
    """One grid step = one prediction map.  Writes bce + (1-ssim) + iou."""
    b = n * c

    pred = preds_ref[0].astype(jnp.float32)        # (N, C, H, W)
    target = labels_ref[...].astype(jnp.float32)   # (N, C, H, W), VMEM resident
    pt = pred * target                             # shared by IoU and sigma12

    # ---- BCE (mean over all elements); log clamped at -100 like torch BCELoss.
    log_p = jnp.maximum(jnp.log(pred), -100.0)
    log_1mp = jnp.maximum(jnp.log(1.0 - pred), -100.0)
    bce = -jnp.mean(target * log_p + (1.0 - target) * log_1mp)

    # ---- IoU loss: mean over batch of (1 - I/U), vectorized over the batch.
    def sum_per_image(x):                          # (N, C, H, W) -> (N, 1)
        return jnp.sum(jnp.sum(x, axis=(2, 3)), axis=1, keepdims=True)

    iand_n = sum_per_image(pt)
    ior_n = sum_per_image(target) + sum_per_image(pred) - iand_n
    iou = jnp.sum(1.0 - iand_n / ior_n) / float(n)

    # ---- SSIM: the three pred-side convs run as ONE fused (3B, H, W) conv;
    # label-side stats come precomputed (resident) from the stats kernel.
    pred_b = pred.reshape(b, h, w)
    slab = jnp.concatenate([pred_b, pred_b * pred_b, pt.reshape(b, h, w)],
                           axis=0).astype(jnp.bfloat16)              # (3B, H, W)
    conv = _conv_same(slab, bw_ref[...], bh_ref[...])                # (3B, H, W) f32
    mu1 = conv[:b]
    mu2 = stats_ref[0]
    sigma1_sq = conv[b:2 * b] - mu1 * mu1
    sigma2_sq = stats_ref[1]
    sigma12 = conv[2 * b:] - mu1 * mu2
    mu1_sq = mu1 * mu1
    mu2_sq = mu2 * mu2
    mu1_mu2 = mu1 * mu2
    ssim_map = ((2.0 * mu1_mu2 + C1) * (2.0 * sigma12 + C2)) / (
        (mu1_sq + mu2_sq + C1) * (sigma1_sq + sigma2_sq + C2))
    ssim_out = 1.0 - jnp.mean(ssim_map)

    # Note: DiceLoss is computed in the reference bce_ssim_loss but never added
    # to the returned loss, so it is intentionally omitted here.
    out_ref[0, 0] = bce + ssim_out + iou


def _vmem_limit_bytes(n, c, h, w):
    """Explicit VMEM budget: shape-derived, clamped inside v7x's 64 MiB."""
    b = n * c
    plane = b * h * w * 4                       # one f32 (B, H, W) plane
    managed = 2 * plane                         # preds block (double-buffered)
    managed += 3 * plane                        # resident labels + 2 stat planes
    managed += 2 * (h * h + w * w)              # bf16 band matrices
    live = 3 * b * h * w * 2 + 12 * plane       # bf16 slab + live f32 temporaries
    need = managed + live
    return int(min(max(2 * need, 32 * 1024 * 1024), 60 * 1024 * 1024))


def bas_loss(preds, labels):
    """preds: (8, N, C, H, W) in (0, 1); labels: (N, C, H, W)."""
    num_preds, n, c, h, w = preds.shape
    b = n * c
    g1d = _gaussian_1d(WINDOW_SIZE, SIGMA)
    # bf16 band matrices -> native-rate MXU matmuls (f32 accumulation in-kernel).
    bh = jnp.asarray(_band_matrix(h, g1d), dtype=jnp.bfloat16)
    bw = jnp.asarray(_band_matrix(w, g1d), dtype=jnp.bfloat16)
    vmem_limit = _vmem_limit_bytes(n, c, h, w)

    # --- one-shot label statistics, reused by all 8 predictions ---
    stats = pl.pallas_call(
        functools.partial(_label_stats_kernel, n=n, c=c, h=h, w=w),
        out_shape=jax.ShapeDtypeStruct((2, b, h, w), jnp.float32),
        grid_spec=pltpu.PrefetchScalarGridSpec(
            num_scalar_prefetch=0,
            grid=(1,),
            in_specs=[
                pl.BlockSpec((n, c, h, w), lambda i: (0, 0, 0, 0)),
                pl.BlockSpec((w, w), lambda i: (0, 0)),
                pl.BlockSpec((h, h), lambda i: (0, 0)),
            ],
            out_specs=pl.BlockSpec((2, b, h, w), lambda i: (0, 0, 0, 0)),
        ),
        compiler_params=pltpu.CompilerParams(
            dimension_semantics=("arbitrary",), vmem_limit_bytes=vmem_limit),
    )(labels, bw, bh)

    # --- main loss kernel: one grid step per prediction, fully parallel ---
    partial_losses = pl.pallas_call(
        functools.partial(_bas_loss_kernel, n=n, c=c, h=h, w=w),
        out_shape=jax.ShapeDtypeStruct((num_preds, 1), jnp.float32),
        grid_spec=pltpu.PrefetchScalarGridSpec(
            num_scalar_prefetch=0,
            grid=(num_preds,),
            in_specs=[
                pl.BlockSpec((1, n, c, h, w), lambda i: (i, 0, 0, 0, 0)),
                # Grid-invariant inputs: constant index_map -> DMA'd from HBM
                # once and kept VMEM-resident across all grid steps.
                pl.BlockSpec((n, c, h, w), lambda i: (0, 0, 0, 0)),
                pl.BlockSpec((2, b, h, w), lambda i: (0, 0, 0, 0)),
                pl.BlockSpec((w, w), lambda i: (0, 0)),
                pl.BlockSpec((h, h), lambda i: (0, 0)),
            ],
            # Per-prediction partials: each step writes its own SMEM scalar, so
            # there is no cross-step dependency and the grid can run parallel.
            out_specs=pl.BlockSpec((1, 1), lambda i: (i, 0),
                                   memory_space=pltpu.MemorySpace.SMEM),
        ),
        compiler_params=pltpu.CompilerParams(
            dimension_semantics=("parallel",), vmem_limit_bytes=vmem_limit),
    )(preds, labels, stats, bw, bh)
    return jnp.sum(partial_losses)


# ------------------------- pure-JAX reference ------------------------------ #
def _ref_bce_ssim_loss(pred, target, window2d):
    bce = jnp.mean(-(target * jnp.maximum(jnp.log(pred), -100.0)
                     + (1.0 - target) * jnp.maximum(jnp.log(1.0 - pred), -100.0)))
    n, c = pred.shape[0], pred.shape[1]
    iou = 0.0
    for i in range(n):
        iand = jnp.sum(target[i] * pred[i])
        ior = jnp.sum(target[i]) + jnp.sum(pred[i]) - iand
        iou = iou + (1.0 - iand / ior)
    iou = iou / n

    K = window2d.shape[0]
    w4 = jnp.tile(jnp.asarray(window2d)[None, None], (c, 1, 1, 1))  # (C,1,K,K)

    def conv(x):
        return jax.lax.conv_general_dilated(
            x, w4, (1, 1), [(K // 2, K // 2)] * 2,
            dimension_numbers=("NCHW", "OIHW", "NCHW"),
            feature_group_count=c)

    mu1, mu2 = conv(pred), conv(target)
    mu1_sq, mu2_sq, mu1_mu2 = mu1 * mu1, mu2 * mu2, mu1 * mu2
    s1 = conv(pred * pred) - mu1_sq
    s2 = conv(target * target) - mu2_sq
    s12 = conv(pred * target) - mu1_mu2
    ssim_map = ((2 * mu1_mu2 + C1) * (2 * s12 + C2)) / ((mu1_sq + mu2_sq + C1) * (s1 + s2 + C2))
    return bce + (1.0 - jnp.mean(ssim_map)) + iou


def _ref_bas_loss(preds, labels, window2d):
    total = 0.0
    for i in range(preds.shape[0]):
        total = total + _ref_bce_ssim_loss(preds[i], labels, window2d)
    return total


if __name__ == "__main__":
    # Small but lane-dense demo shape (W multiple of 128); C=1 as in BASNet.
    N, C, H, W = 2, 1, 32, 128
    key = jax.random.PRNGKey(0)
    k_pred, k_lab = jax.random.split(key)

    preds = jax.nn.sigmoid(jax.random.normal(k_pred, (8, N, C, H, W), jnp.float32))
    labels = (jax.random.uniform(k_lab, (N, C, H, W)) > 0.5).astype(jnp.float32)

    loss = bas_loss(preds, labels)
    jax.block_until_ready(loss)

    ref = _ref_bas_loss(preds, labels, _gaussian_window_2d(WINDOW_SIZE, SIGMA))
    # Tolerance accounts for bf16 MXU operands (f32 accumulation) in the SSIM
    # convolutions; total loss magnitude here is ~20.
    np.testing.assert_allclose(np.asarray(loss), np.asarray(ref), rtol=2e-3, atol=2e-3)

    print("KERNEL_OK")
</pallas_src>

<mosaic_0001>
module attributes {stable_mosaic.version = 11 : i64} {
  func.func @_label_stats_kernel(%arg0: i32, %arg1: memref<2x1x32x128xf32, #tpu.memory_space<vmem>>, %arg2: memref<128x128xbf16, #tpu.memory_space<vmem>>, %arg3: memref<32x32xbf16, #tpu.memory_space<vmem>>, %arg4: memref<2x2x32x128xf32, #tpu.memory_space<vmem>>) attributes {dimension_semantics = [#tpu.dimension_semantics<arbitrary>], iteration_bounds = array<i64: 1>, scalar_prefetch = 0 : i64, scratch_operands = 0 : i64, tpu.core_type = #tpu.core_type<tc>, window_params = [{pipeline_mode = #tpu.pipeline_mode<synchronous>, transform_indices = @transform_0, window_bounds = array<i64: 2, 1, 32, 128>}, {pipeline_mode = #tpu.pipeline_mode<synchronous>, transform_indices = @transform_1, window_bounds = array<i64: 128, 128>}, {pipeline_mode = #tpu.pipeline_mode<synchronous>, transform_indices = @transform_2, window_bounds = array<i64: 32, 32>}, {pipeline_mode = #tpu.pipeline_mode<synchronous>, transform_indices = @transform_3, window_bounds = array<i64: 2, 2, 32, 128>}]} {
    %c0 = arith.constant 0 : index
    %c0_0 = arith.constant 0 : index
    %c0_1 = arith.constant 0 : index
    %c0_2 = arith.constant 0 : index
    %0 = vector.load %arg1[%c0, %c0_0, %c0_1, %c0_2] : memref<2x1x32x128xf32, #tpu.memory_space<vmem>>, vector<2x1x32x128xf32>
    %1 = vector.shape_cast %0 : vector<2x1x32x128xf32> to vector<2x32x128xf32>
    %2 = arith.mulf %1, %1 : vector<2x32x128xf32>
    %3 = tpu.concatenate %1, %2 in 0 : vector<2x32x128xf32>, vector<2x32x128xf32> -> vector<4x32x128xf32>
    %4 = arith.truncf %3 : vector<4x32x128xf32> to vector<4x32x128xbf16>
    %c0_3 = arith.constant 0 : index
    %c0_4 = arith.constant 0 : index
    %5 = vector.load %arg2[%c0_3, %c0_4] : memref<128x128xbf16, #tpu.memory_space<vmem>>, vector<128x128xbf16>
    %c0_5 = arith.constant 0 : index
    %c0_6 = arith.constant 0 : index
    %6 = vector.load %arg3[%c0_5, %c0_6] : memref<32x32xbf16, #tpu.memory_space<vmem>>, vector<32x32xbf16>
    %7 = vector.shape_cast %4 : vector<4x32x128xbf16> to vector<128x128xbf16>
    %cst = arith.constant dense<0.000000e+00> : vector<128x128xf32>
    %8 = tpu.matmul %7, %5, %cst {dimension_numbers = #tpu.dot_dimension_numbers<[1], [0], [0], [1], [0, 0, 1, 1], [], []>} : vector<128x128xbf16>, vector<128x128xbf16>, vector<128x128xf32> -> vector<128x128xf32>
    %9 = vector.shape_cast %8 : vector<128x128xf32> to vector<4x32x128xf32>
    %10 = tpu.transpose %9, [0, 2, 1] : vector<4x32x128xf32> -> vector<4x128x32xf32>
    %11 = arith.truncf %10 : vector<4x128x32xf32> to vector<4x128x32xbf16>
    %12 = vector.shape_cast %11 : vector<4x128x32xbf16> to vector<512x32xbf16>
    %cst_7 = arith.constant dense<0.000000e+00> : vector<512x32xf32>
    %13 = tpu.matmul %12, %6, %cst_7 {dimension_numbers = #tpu.dot_dimension_numbers<[1], [0], [0], [1], [0, 0, 1, 1], [], []>} : vector<512x32xbf16>, vector<32x32xbf16>, vector<512x32xf32> -> vector<512x32xf32>
    %14 = vector.shape_cast %13 : vector<512x32xf32> to vector<4x128x32xf32>
    %15 = tpu.transpose %14, [0, 2, 1] : vector<4x128x32xf32> -> vector<4x32x128xf32>
    %16 = vector.extract_strided_slice %15 {offsets = [0, 0, 0], sizes = [2, 32, 128], strides = [1, 1, 1]} : vector<4x32x128xf32> to vector<2x32x128xf32>
    %c0_8 = arith.constant 0 : index
    %c0_9 = arith.constant 0 : index
    %c0_10 = arith.constant 0 : index
    %c0_11 = arith.constant 0 : index
    %17 = vector.load %arg4[%c0_8, %c0_9, %c0_10, %c0_11] : memref<2x2x32x128xf32, #tpu.memory_space<vmem>>, vector<1x2x32x128xf32>
    %18 = vector.shape_cast %17 : vector<1x2x32x128xf32> to vector<2x32x128xf32>
    %19 = vector.shape_cast %16 : vector<2x32x128xf32> to vector<1x2x32x128xf32>
    tpu.vector_store %arg4[%c0_8, %c0_9, %c0_10, %c0_11], %19 {strides = array<i32>} : memref<2x2x32x128xf32, #tpu.memory_space<vmem>>, vector<1x2x32x128xf32>,
    %20 = vector.extract_strided_slice %15 {offsets = [2, 0, 0], sizes = [2, 32, 128], strides = [1, 1, 1]} : vector<4x32x128xf32> to vector<2x32x128xf32>
    %21 = arith.mulf %16, %16 : vector<2x32x128xf32>
    %22 = arith.subf %20, %21 : vector<2x32x128xf32>
    %c1 = arith.constant 1 : index
    %c0_12 = arith.constant 0 : index
    %c0_13 = arith.constant 0 : index
    %c0_14 = arith.constant 0 : index
    %23 = vector.load %arg4[%c1, %c0_12, %c0_13, %c0_14] : memref<2x2x32x128xf32, #tpu.memory_space<vmem>>, vector<1x2x32x128xf32>
    %24 = vector.shape_cast %23 : vector<1x2x32x128xf32> to vector<2x32x128xf32>
    %25 = vector.shape_cast %22 : vector<2x32x128xf32> to vector<1x2x32x128xf32>
    tpu.vector_store %arg4[%c1, %c0_12, %c0_13, %c0_14], %25 {strides = array<i32>} : memref<2x2x32x128xf32, #tpu.memory_space<vmem>>, vector<1x2x32x128xf32>,
    return
  }
  func.func @transform_0(%arg0: i32) -> (i32, i32, i32, i32) {
    %c0_i32 = arith.constant 0 : i32
    %c0_i32_0 = arith.constant 0 : i32
    %c0_i32_1 = arith.constant 0 : i32
    %c0_i32_2 = arith.constant 0 : i32
    %c0_i32_3 = arith.constant 0 : i32
    return %c0_i32, %c0_i32_0, %c0_i32_1, %c0_i32_2 : i32, i32, i32, i32
  }
  func.func @transform_1(%arg0: i32) -> (i32, i32) {
    %c0_i32 = arith.constant 0 : i32
    %c0_i32_0 = arith.constant 0 : i32
    %c0_i32_1 = arith.constant 0 : i32
    return %c0_i32, %c0_i32_0 : i32, i32
  }
  func.func @transform_2(%arg0: i32) -> (i32, i32) {
    %c0_i32 = arith.constant 0 : i32
    %c0_i32_0 = arith.constant 0 : i32
    %c0_i32_1 = arith.constant 0 : i32
    return %c0_i32, %c0_i32_0 : i32, i32
  }
  func.func @transform_3(%arg0: i32) -> (i32, i32, i32, i32) {
    %c0_i32 = arith.constant 0 : i32
    %c0_i32_0 = arith.constant 0 : i32
    %c0_i32_1 = arith.constant 0 : i32
    %c0_i32_2 = arith.constant 0 : i32
    %c0_i32_3 = arith.constant 0 : i32
    return %c0_i32, %c0_i32_0, %c0_i32_1, %c0_i32_2 : i32, i32, i32, i32
  }
}

</mosaic_0001>

<bundles_post_ra>
// kernel: tpu_custom_call.1
= control target key start
LH: loop header
LB: loop body
LE: loop exit
PB: predicated region body
PF: predicated region fallthrough
CT: control target
= control target key end

     0   :  { %8 = vsyncpa [#allocation3], 0  ;;  %s1655_s0 = inlined_call_operand.hbm [shape: f32[2,1,32,128], index: 0, kind: input, shape index: {}]   ;;  %s1656_s1 = inlined_call_operand.hbm [shape: bf16[128,128], index: 1, kind: input, shape index: {}]   ;;  %s1657_s2 = inlined_call_operand.hbm [shape: bf16[32,32], index: 2, kind: input, shape index: {}]   ;;  %s1658_s3 = inlined_call_operand.hbm [shape: f32[2,2,32,128], index: 3, kind: output, shape index: {}]  }
   0x1   :  { %9 = vsyncpa [#allocation6], 0 }
   0x2   :  { %10 = vsyncpa [#allocation4], 0  ;;  %s1468_s12 = smov [#allocation5]   ;;  %s1374_s16 = scalar_lea.hbm %s1656_s1, 1024 }
   0x3   :  { %s28_s13 = sshll.u32 %s1468_s12, 4  ;;  %p1375_p0 = scmp.ne.s32.totalorder %s1656_s1, %s1374_s16  ;;  %s29_s13 = int_to_ptr.vmem [resolvable:$true] %s28_s13 }
   0x4   :  { %p1378_p1 = scmp.lt.u32.totalorder %s1374_s16, %s1656_s1 }
   0x6   :  { %p1380_p2 = pnand %p1378_p1, %p1375_p0 }
   0x8   :  { %1383 = shalt.err (!%p1380_p2)
}
   0x9   :  { %s1384_s21 = scalar_lea.vmem %s29_s13, 1024  ;;  %p1389_p4 = scmp.lt.s32.totalorder %s29_s13, %s29_s13 }
   0xa   :  { %p1385_p3 = scmp.ne.s32.totalorder %s29_s13, %s1384_s21  ;;  %p1390_p5 = scmp.lt.s32.totalorder %s1384_s21, %s1384_s21 }
   0xc   :  { %p1391_p6 = por %p1390_p5, %p1389_p4 }
   0xe   :  { %p1392_p7 = pnand %p1391_p6, %p1385_p3 }
  0x10   :  { %1395 = shalt.err (!%p1392_p7)
}
  0x11   :  { %s1469_s22 = smov 64   ;;  %s1470_s23 = smov 4  }
  0x12   :  { %34 = dma.hbm_to_vmem [thread:$0]  %s1656_s1, 1024, %s29_s13, [#allocation6], %s1469_s22, %s1469_s22, %s1470_s23  }
  0x13   :  { %s1471_s26 = smov [#allocation2]   ;;  %s1396_s30 = scalar_lea.hbm %s1655_s0, 1024 }
  0x14   :  { %s16_s27 = sshll.u32 %s1471_s26, 4  ;;  %p1397_p8 = scmp.ne.s32.totalorder %s1655_s0, %s1396_s30  ;;  %s17_s27 = int_to_ptr.vmem [resolvable:$true] %s16_s27 }
  0x15   :  { %p1400_p9 = scmp.lt.u32.totalorder %s1396_s30, %s1655_s0 }
  0x17   :  { %p1402_p10 = pnand %p1400_p9, %p1397_p8 }
  0x19   :  { %1405 = shalt.err (!%p1402_p10)
}
  0x1a   :  { %s1406_s8 = scalar_lea.vmem %s17_s27, 1024  ;;  %p1411_p12 = scmp.lt.s32.totalorder %s17_s27, %s17_s27 }
  0x1b   :  { %p1407_p11 = scmp.ne.s32.totalorder %s17_s27, %s1406_s8  ;;  %p1412_p13 = scmp.lt.s32.totalorder %s1406_s8, %s1406_s8 }
  0x1d   :  { %p1413_p0 = por %p1412_p13, %p1411_p12 }
  0x1f   :  { %p1414_p1 = pnand %p1413_p0, %p1407_p11 }
  0x21   :  { %1417 = shalt.err (!%p1414_p1)
}
  0x22   :  { %s1472_s1 = smov 128   ;;  %s1473_s9 = smov 8  }
  0x23   :  { %22 = dma.hbm_to_vmem [thread:$0]  %s1655_s0, 1024, %s17_s27, [#allocation3], %s1472_s1, %s1472_s1, %s1473_s9  }
  0x24   :  { %s1474_s12 = smov [#allocation7]   ;;  %s1418_s16 = scalar_lea.hbm %s1657_s2, 256 }
  0x25   :  { %s40_s13 = sshll.u32 %s1474_s12, 4  ;;  %p1419_p2 = scmp.ne.s32.totalorder %s1657_s2, %s1418_s16  ;;  %s41_s13 = int_to_ptr.vmem [resolvable:$true] %s40_s13 }
  0x26   :  { %p1422_p3 = scmp.lt.u32.totalorder %s1418_s16, %s1657_s2 }
  0x28   :  { %p1424_p4 = pnand %p1422_p3, %p1419_p2 }
  0x2a   :  { %1427 = shalt.err (!%p1424_p4)
}
  0x2b   :  { %s1428_s21 = scalar_lea.vmem %s41_s13, 256  ;;  %p1433_p6 = scmp.lt.s32.totalorder %s41_s13, %s41_s13 }
  0x2c   :  { %p1429_p5 = scmp.ne.s32.totalorder %s41_s13, %s1428_s21  ;;  %p1434_p7 = scmp.lt.s32.totalorder %s1428_s21, %s1428_s21 }
  0x2e   :  { %p1435_p8 = por %p1434_p7, %p1433_p6 }
  0x30   :  { %p1436_p9 = pnand %p1435_p8, %p1429_p5 }
  0x32   :  { %1439 = shalt.err (!%p1436_p9)
}
  0x33   :  { %46 = dma.hbm_to_vmem [thread:$0]  %s1657_s2, 256, %s41_s13, [#allocation6], %s1469_s22, %s1469_s22, %s1470_s23  }
  0x34   :  { %1462 = dma.done.wait [#allocation3], 1024  }
  0x35   :  { %1463 = vsyncadd [#allocation3], 4294966272 }
  0x36   :  { %1464 = dma.done.wait [#allocation6], 1280  }
  0x37   :  { %1465 = vsyncadd [#allocation6], 4294966016  ;;  %v1364_v0 = vld [vmem:[#allocation5] sm:$0xff]   ;;  %v1365_v1 = vld [vmem:[#allocation5 + $0x8] sm:$0xff]   ;;  %vm418_vm0 = vcmask 261120   ;;  %s1475_s2 = smov [#allocation8]  }
  0x38   :  { %1075 = vmatprep.subr.bf16.mxu0 %v1364_v0  ;;  %v1366_v2 = vld [vmem:[#allocation5 + $0x10] sm:$0xff]   ;;  %v1367_v3 = vld [vmem:[#allocation5 + $0x18] sm:$0xff]   ;;  %v57_v4 = vld [vmem:[#allocation2] sm:$0xff]  ;;  %s970_s22 = sshll.u32 %s1475_s2, 4  ;;  %s971_s22 = int_to_ptr.vmem [resolvable:$true] %s970_s22 }
  0x39   :  { %1076 = vmatpush3.bf16.msra.mxu0 %v1364_v0  ;;  %v58_v5 = vld [vmem:[#allocation2 + $0x8] sm:$0xff]  ;;  %v1368_v7 = vld [vmem:[#allocation5 + $0x20] sm:$0xff]   ;;  %v1370_v9 = vld [vmem:[#allocation5 + $0x30] sm:$0xff]   ;;  %v65_v17 = vmul.f32 %v57_v4, %v57_v4  ;;  %s1440_s23 = scalar_lea.vmem %s971_s22, 2048  ;;  %p1445_p11 = scmp.lt.s32.totalorder %s971_s22, %s971_s22 }
  0x3a   :  { %1077 = vmatprep.subr.bf16.mxu0 %v1365_v1  ;;  %v73_v6 = vpack.c.bf16 %v58_v5, %v57_v4  ;;  %v1369_v8 = vld [vmem:[#allocation5 + $0x28] sm:$0xff]   ;;  %v1371_v10 = vld [vmem:[#allocation5 + $0x38] sm:$0xff]   ;;  %v59_v11 = vld [vmem:[#allocation2 + $0x10] sm:$0xff]  ;;  %v66_v18 = vmul.f32 %v58_v5, %v58_v5  ;;  %p1441_p10 = scmp.ne.s32.totalorder %s971_s22, %s1440_s23  ;;  %p1446_p12 = scmp.lt.s32.totalorder %s1440_s23, %s1440_s23 }
  0x3b   :  { %v60_v12 = vld [vmem:[#allocation2 + $0x18] sm:$0xff]  ;;  %v61_v13 = vld [vmem:[#allocation2 + $0x20] sm:$0xff]  ;;  %v62_v14 = vld [vmem:[#allocation2 + $0x28] sm:$0xff]  ;;  %v67_v23 = vmul.f32 %v59_v11, %v59_v11 }
  0x3c   :  { %1091 = vmatprep.mubr.bf16.mxu0 %v73_v6  ;;  %v74_v15 = vpack.c.bf16 %v60_v12, %v59_v11  ;;  %v75_v16 = vpack.c.bf16 %v62_v14, %v61_v13  ;;  %v63_v19 = vld [vmem:[#allocation2 + $0x30] sm:$0xff]  ;;  %v64_v20 = vld [vmem:[#allocation2 + $0x38] sm:$0xff]  ;;  %v77_v22 = vpack.c.bf16 %v66_v18, %v65_v17  ;;  %v68_v24 = vmul.f32 %v60_v12, %v60_v12  ;;  %v1372_v51 = vld [vmem:[#allocation7] sm:$0xff]   ;;  %p1447_p13 = por %p1446_p12, %p1445_p11 }
  0x3d   :  { %1078 = vmatpush3.bf16.msra.mxu0 %v1365_v1  ;;  %v76_v21 = vpack.c.bf16 %v64_v20, %v63_v19  ;;  %v69_v25 = vmul.f32 %v61_v13, %v61_v13  ;;  %v70_v26 = vmul.f32 %v62_v14, %v62_v14  ;;  %v71_v29 = vmul.f32 %v63_v19, %v63_v19  ;;  %v1373_v57 = vld [vmem:[#allocation7 + $0x8] sm:$0xff]  }
  0x3e   :  { %1079 = vmatprep.subr.bf16.mxu0 %v1366_v2  ;;  %v78_v27 = vpack.c.bf16 %v68_v24, %v67_v23  ;;  %v72_v30 = vmul.f32 %v64_v20, %v64_v20  ;;  %1175 = vmatprep.subr.bf16.mxu1 %v1372_v51  ;;  %p1448_p0 = pnand %p1447_p13, %p1441_p10 }
  0x3f   :  { %v79_v28 = vpack.c.bf16 %v70_v26, %v69_v25  ;;  %1177 = vmatpush3.bf16.msra.mxu1 %v1372_v51 }
  0x40   :  { %v80_v31 = vpack.c.bf16 %v72_v30, %v71_v29  ;;  %1176 = vmatprep.subr.bf16.mxu1 %v1373_v57 }
  0x41   :  { %1080 = vmatpush3.bf16.msra.mxu0 %v1366_v2 }
  0x42   :  { %1081 = vmatprep.subr.bf16.mxu0 %v1367_v3 }
  0x43   :  { %1178 = vmatpush3.bf16.msra.mxu1 %v1373_v57 }
  0x45   :  { %1082 = vmatpush3.bf16.msra.mxu0 %v1367_v3 }
  0x46   :  { %1083 = vmatprep.subr.bf16.mxu0 %v1368_v7 }
  0x49   :  { %1084 = vmatpush3.bf16.msra.mxu0 %v1368_v7 }
  0x4a   :  { %1085 = vmatprep.subr.bf16.mxu0 %v1369_v8 }
  0x4d   :  { %1086 = vmatpush3.bf16.msra.mxu0 %v1369_v8 }
  0x4e   :  { %1087 = vmatprep.subr.bf16.mxu0 %v1370_v9 }
  0x51   :  { %1088 = vmatpush3.bf16.msra.mxu0 %v1370_v9 }
  0x52   :  { %1089 = vmatprep.subr.bf16.mxu0 %v1371_v10 }
  0x55   :  { %1090 = vmatpush3.bf16.msra.mxu0 %v1371_v10 }
  0x56   :  { %1107 = vmatprep.subr.bf16.mxu0 %v1372_v51 }
  0x58   :  { %1092 = vmatmul.mubr.bf16.vlgmr.msra.gmra.mrb[0].mxu0 %v74_v15 }
  0x59   :  { %1095 = vmatprep.mubr.bf16.mxu0 %v75_v16  ;;  %1108 = vmatpush3.bf16.msra.mxu0 %v1372_v51 }
  0x5a   :  { %1109 = vmatprep.subr.bf16.mxu0 %v1373_v57 }
  0x5d   :  { %1110 = vmatpush3.bf16.msra.mxu0 %v1373_v57 }
  0x60   :  { %1096 = vmatmul.mubr.bf16.gmra.mrb[4].mxu0 %v76_v21 }
  0x61   :  { %1099 = vmatprep.mubr.bf16.mxu0 %v77_v22 }
  0x68   :  { %1100 = vmatmul.mubr.bf16.gmra.mrb[8].mxu0 %v78_v27 }
  0x69   :  { %1103 = vmatprep.mubr.bf16.mxu0 %v79_v28 }
  0x70   :  { %1104 = vmatmul.mubr.bf16.gmra.mrb[12].mxu0 %v80_v31 }
 0x12b   :  { %v1093_v32 = vpop.f32.mrb[0].mxu0 }
 0x12c   :  { %v183_v33 = vpop.f32.mrb[1].mxu0 }
 0x12d   :  { %v1094_v34 = vpop.f32.mrb[2].mxu0 }
 0x12e   :  { %v186_v35 = vpop.f32.mrb[3].mxu0 }
 0x133   :  { %v1097_v36 = vpop.f32.mrb[4].mxu0 }
 0x134   :  { %v199_v37 = vpop.f32.mrb[5].mxu0 }
 0x135   :  { %v1098_v38 = vpop.f32.mrb[6].mxu0 }
 0x136   :  { %v202_v39 = vpop.f32.mrb[7].mxu0 }
 0x13b   :  { %v1101_v40 = vpop.f32.mrb[8].mxu0 }
 0x13c   :  { %v1192_v41 = vpack.i.bf16 %v1101_v40, %v1097_v36  ;;  %v215_v42 = vpop.f32.mrb[9].mxu0 }
 0x13d   :  { %v1102_v43 = vpop.f32.mrb[10].mxu0  ;;  %v1188_v44 = vpack.i.bf16 %v215_v42, %v199_v37 }
 0x13e   :  { %v1194_v45 = vpack.i.bf16 %v1102_v43, %v1098_v38  ;;  %v218_v46 = vpop.f32.mrb[11].mxu0 }
 0x13f   :  { %v1190_v47 = vpack.i.bf16 %v218_v46, %v202_v39  ;;  %1189 = vxpose.xlu0.b32.start [1/4] (short) %v1188_v44, 128 }
 0x143   :  { %1191 = vxpose.xlu0.b32.cont [2/4] (short) %v1190_v47, 128  ;;  %v1105_v48 = vpop.f32.mrb[12].mxu0 }
 0x144   :  { %v1280_v49 = vpack.i.bf16 %v1105_v48, %v1093_v32  ;;  %v231_v50 = vpop.f32.mrb[13].mxu0 }
 0x145   :  { %v1106_v52 = vpop.f32.mrb[14].mxu0  ;;  %v1276_v53 = vpack.i.bf16 %v231_v50, %v183_v33 }
 0x146   :  { %v1282_v54 = vpack.i.bf16 %v1106_v52, %v1094_v34  ;;  %v234_v55 = vpop.f32.mrb[15].mxu0 }
 0x147   :  { %v1278_v56 = vpack.i.bf16 %v234_v55, %v186_v35  ;;  %1193 = vxpose.xlu0.b32.cont [3/4] (short) %v1192_v41, 128  ;;  %1277 = vxpose.xlu1.b32.start [1/4] (short) %v1276_v53, 128 }
 0x14b   :  { %1195 = vxpose.xlu0.b32.end [4/4] (short) %v1194_v45, 128  ;;  %1279 = vxpose.xlu1.b32.cont [2/4] (short) %v1278_v56, 128 }
 0x14f   :  { %1281 = vxpose.xlu1.b32.cont [3/4] (short) %v1280_v49, 128 }
 0x153   :  { %1283 = vxpose.xlu1.b32.end [4/4] (short) %v1282_v54, 128 }
 0x1bf   :  { %v1541_v58 = vpop.trf.xlu0 }
 0x1c0   :  { %v1197_v61 = vunpack.i.l.bf16 %v1541_v58 }
 0x1c3   :  { %v1543_v59 = vpop.trf.xlu0 }
 0x1c4   :  { %v1202_v60 = vunpack.i.l.bf16 %v1543_v59 }
 0x1c6   :  { %v382_v62 = vpack.c.bf16 %v1202_v60, %v1197_v61 }
 0x1c7   :  { %v1547_v63 = vpop.trf.xlu0  ;;  %v1284_v0 = vpop.trf.xlu1 }
 0x1c8   :  { %1127 = vmatprep.mubr.msk.bf16.mxu1 %vm418_vm0, %v382_v62  ;;  %v1288_v1 = vunpack.i.h.bf16 %v1284_v0  ;;  %v1285_v2 = vunpack.i.l.bf16 %v1284_v0  ;;  %v1207_v5 = vunpack.i.l.bf16 %v1547_v63 }
 0x1cb   :  { %v1550_v3 = vpop.trf.xlu0  ;;  %v1289_v4 = vpop.trf.xlu1 }
 0x1cc   :  { %v1212_v6 = vunpack.i.l.bf16 %v1550_v3  ;;  %v1293_v7 = vunpack.i.h.bf16 %v1289_v4  ;;  %v1290_v8 = vunpack.i.l.bf16 %v1289_v4 }
 0x1ce   :  { %v383_v9 = vpack.c.bf16 %v1212_v6, %v1207_v5  ;;  %v374_v12 = vpack.c.bf16 %v1290_v8, %v1285_v2  ;;  %v1556_v13 = vpack.c.bf16 %v1293_v7, %v1288_v1 }
 0x1cf   :  { %v1554_v10 = vpop.trf.xlu0  ;;  %v1294_v11 = vpop.trf.xlu1 }
 0x1d0   :  { %1128 = vmatmul.mubr.msk.bf16.vlgmr.msra.gmra.mrb[0].mxu1 %vm418_vm0, %v383_v9  ;;  %1111 = vmatprep.mubr.msk.bf16.mxu0 %vm418_vm0, %v374_v12  ;;  %v1298_v14 = vunpack.i.h.bf16 %v1294_v11  ;;  %v1295_v15 = vunpack.i.l.bf16 %v1294_v11  ;;  %v1217_v18 = vunpack.i.l.bf16 %v1554_v10 }
 0x1d3   :  { %v1560_v16 = vpop.trf.xlu0  ;;  %v1299_v17 = vpop.trf.xlu1 }
 0x1d4   :  { %v1222_v19 = vunpack.i.l.bf16 %v1560_v16  ;;  %v1303_v20 = vunpack.i.h.bf16 %v1299_v17  ;;  %v1300_v21 = vunpack.i.l.bf16 %v1299_v17 }
 0x1d6   :  { %v384_v22 = vpack.c.bf16 %v1222_v19, %v1217_v18  ;;  %v375_v23 = vpack.c.bf16 %v1300_v21, %v1295_v15  ;;  %v1566_v26 = vpack.c.bf16 %v1303_v20, %v1298_v14 }
 0x1d7   :  { %v1564_v24 = vpop.trf.xlu0  ;;  %v1304_v25 = vpop.trf.xlu1 }
 0x1d8   :  { %1131 = vmatprep.mubr.msk.bf16.mxu1 %vm418_vm0, %v384_v22  ;;  %1112 = vmatmul.mubr.msk.bf16.vlgmr.msra.gmra.mrb[16].mxu0 %vm418_vm0, %v375_v23  ;;  %v1308_v27 = vunpack.i.h.bf16 %v1304_v25  ;;  %v1305_v28 = vunpack.i.l.bf16 %v1304_v25  ;;  %v1227_v31 = vunpack.i.l.bf16 %v1564_v24  ;;  %v1205_v22 = vunpack.i.h.bf16 %v1543_v59 }
 0x1d9   :  { %v1215_v59 = vunpack.i.h.bf16 %v1550_v3 }
 0x1db   :  { %v1570_v29 = vpop.trf.xlu0  ;;  %v1309_v30 = vpop.trf.xlu1 }
 0x1dc   :  { %v1232_v32 = vunpack.i.l.bf16 %v1570_v29  ;;  %v1313_v33 = vunpack.i.h.bf16 %v1309_v30  ;;  %v1310_v34 = vunpack.i.l.bf16 %v1309_v30  ;;  %v1235_v3 = vunpack.i.h.bf16 %v1570_v29 }
 0x1de   :  { %v385_v35 = vpack.c.bf16 %v1232_v32, %v1227_v31  ;;  %v376_v38 = vpack.c.bf16 %v1310_v34, %v1305_v28  ;;  %v1576_v39 = vpack.c.bf16 %v1313_v33, %v1308_v27  ;;  %v1200_v31 = vunpack.i.h.bf16 %v1541_v58 }
 0x1df   :  { %v1574_v36 = vpop.trf.xlu0  ;;  %v1314_v37 = vpop.trf.xlu1 }
 0x1e0   :  { %1132 = vmatmul.mubr.msk.bf16.gmra.mrb[4].mxu1 %vm418_vm0, %v385_v35  ;;  %1115 = vmatprep.mubr.msk.bf16.mxu0 %vm418_vm0, %v376_v38  ;;  %v1318_v40 = vunpack.i.h.bf16 %v1314_v37  ;;  %v1315_v41 = vunpack.i.l.bf16 %v1314_v37  ;;  %v1237_v44 = vunpack.i.l.bf16 %v1574_v36  ;;  %v390_v35 = vpack.c.bf16 %v1205_v22, %v1200_v31 }
 0x1e3   :  { %v1580_v42 = vpop.trf.xlu0  ;;  %v1319_v43 = vpop.trf.xlu1 }
 0x1e4   :  { %v1242_v45 = vunpack.i.l.bf16 %v1580_v42  ;;  %v1323_v46 = vunpack.i.h.bf16 %v1319_v43  ;;  %v1320_v47 = vunpack.i.l.bf16 %v1319_v43  ;;  %v1210_v43 = vunpack.i.h.bf16 %v1547_v63 }
 0x1e5   :  { %v1240_v63 = vunpack.i.h.bf16 %v1574_v36 }
 0x1e6   :  { %v386_v48 = vpack.c.bf16 %v1242_v45, %v1237_v44  ;;  %v377_v51 = vpack.c.bf16 %v1320_v47, %v1315_v41  ;;  %v1586_v52 = vpack.c.bf16 %v1323_v46, %v1318_v40  ;;  %v1225_v40 = vunpack.i.h.bf16 %v1560_v16 }
 0x1e7   :  { %v1584_v49 = vpop.trf.xlu0  ;;  %v1324_v50 = vpop.trf.xlu1  ;;  %v1220_v44 = vunpack.i.h.bf16 %v1554_v10  ;;  %v391_v46 = vpack.c.bf16 %v1215_v59, %v1210_v43  ;;  %v1230_v16 = vunpack.i.h.bf16 %v1564_v24 }
 0x1e8   :  { %1135 = vmatprep.mubr.msk.bf16.mxu1 %vm418_vm0, %v386_v48  ;;  %1116 = vmatmul.mubr.msk.bf16.gmra.mrb[20].mxu0 %vm418_vm0, %v377_v51  ;;  %v1328_v53 = vunpack.i.h.bf16 %v1324_v50  ;;  %v1325_v54 = vunpack.i.l.bf16 %v1324_v50  ;;  %v1247_v57 = vunpack.i.l.bf16 %v1584_v49  ;;  %v1245_v48 = vunpack.i.h.bf16 %v1580_v42 }
 0x1e9   :  { %v392_v47 = vpack.c.bf16 %v1225_v40, %v1220_v44  ;;  %v393_v50 = vpack.c.bf16 %v1235_v3, %v1230_v16 }
 0x1ea   :  { %v394_v51 = vpack.c.bf16 %v1245_v48, %v1240_v63 }
 0x1eb   :  { %v1590_v55 = vpop.trf.xlu0  ;;  %v1329_v56 = vpop.trf.xlu1 }
 0x1ec   :  { %v1252_v60 = vunpack.i.l.bf16 %v1590_v55  ;;  %v1333_v61 = vunpack.i.h.bf16 %v1329_v56  ;;  %v1330_v62 = vunpack.i.l.bf16 %v1329_v56  ;;  %v1255_v10 = vunpack.i.h.bf16 %v1590_v55 }
 0x1ee   :  { %v387_v0 = vpack.c.bf16 %v1252_v60, %v1247_v57  ;;  %v378_v4 = vpack.c.bf16 %v1330_v62, %v1325_v54  ;;  %v1596_v5 = vpack.c.bf16 %v1333_v61, %v1328_v53  ;;  %v1250_v54 = vunpack.i.h.bf16 %v1584_v49 }
 0x1ef   :  { %v1594_v1 = vpop.trf.xlu0  ;;  %v1334_v2 = vpop.trf.xlu1 }
 0x1f0   :  { %1136 = vmatmul.mubr.msk.bf16.gmra.mrb[8].mxu1 %vm418_vm0, %v387_v0  ;;  %1119 = vmatprep.mubr.msk.bf16.mxu0 %vm418_vm0, %v378_v4  ;;  %v1338_v6 = vunpack.i.h.bf16 %v1334_v2  ;;  %v1335_v7 = vunpack.i.l.bf16 %v1334_v2  ;;  %v1257_v11 = vunpack.i.l.bf16 %v1594_v1  ;;  %v1260_v56 = vunpack.i.h.bf16 %v1594_v1 }
 0x1f1   :  { %v395_v29 = vpack.c.bf16 %v1255_v10, %v1250_v54 }
 0x1f3   :  { %v1261_v8 = vpop.trf.xlu0  ;;  %v1339_v9 = vpop.trf.xlu1 }
 0x1f4   :  { %v1262_v12 = vunpack.i.l.bf16 %v1261_v8  ;;  %v1343_v14 = vunpack.i.h.bf16 %v1339_v9  ;;  %v1340_v15 = vunpack.i.l.bf16 %v1339_v9  ;;  %v1265_v53 = vunpack.i.h.bf16 %v1261_v8 }
 0x1f6   :  { %v388_v17 = vpack.c.bf16 %v1262_v12, %v1257_v11  ;;  %v379_v20 = vpack.c.bf16 %v1340_v15, %v1335_v7  ;;  %v403_v21 = vpack.c.bf16 %v1343_v14, %v1338_v6  ;;  %v396_v57 = vpack.c.bf16 %v1265_v53, %v1260_v56 }
 0x1f7   :  { %v1266_v18 = vpop.trf.xlu0  ;;  %v1344_v19 = vpop.trf.xlu1 }
 0x1f8   :  { %1139 = vmatprep.mubr.msk.bf16.mxu1 %vm418_vm0, %v388_v17  ;;  %1120 = vmatmul.mubr.msk.bf16.gmra.mrb[24].mxu0 %vm418_vm0, %v379_v20  ;;  %v1345_v23 = vunpack.i.l.bf16 %v1344_v19  ;;  %v1267_v28 = vunpack.i.l.bf16 %v1266_v18  ;;  %v1270_v36 = vunpack.i.h.bf16 %v1266_v18  ;;  %v1348_v49 = vunpack.i.h.bf16 %v1344_v19 }
 0x1fb   :  { %v1271_v25 = vpop.trf.xlu0  ;;  %v1349_v27 = vpop.trf.xlu1 }
 0x1fc   :  { %v1272_v30 = vunpack.i.l.bf16 %v1271_v25  ;;  %v1350_v32 = vunpack.i.l.bf16 %v1349_v27  ;;  %v1275_v24 = vunpack.i.h.bf16 %v1271_v25  ;;  %v1353_v55 = vunpack.i.h.bf16 %v1349_v27 }
 0x1fe   :  { %v389_v33 = vpack.c.bf16 %v1272_v30, %v1267_v28  ;;  %v380_v37 = vpack.c.bf16 %v1350_v32, %v1345_v23  ;;  %v397_v42 = vpack.c.bf16 %v1275_v24, %v1270_v36  ;;  %v404_v60 = vpack.c.bf16 %v1353_v55, %v1348_v49 }
 0x1ff   :  { %v1354_v34 = vpop.trf.xlu1 }
 0x200   :  { %1140 = vmatmul.mubr.msk.bf16.gmra.mrb[12].mxu1 %vm418_vm0, %v389_v33  ;;  %1123 = vmatprep.mubr.msk.bf16.mxu0 %vm418_vm0, %v380_v37  ;;  %v1355_v38 = vunpack.i.l.bf16 %v1354_v34 }
 0x201   :  { %1143 = vmatprep.mubr.msk.bf16.mxu1 %vm418_vm0, %v390_v35 }
 0x203   :  { %v1359_v41 = vpop.trf.xlu1 }
 0x204   :  { %v1360_v58 = vunpack.i.l.bf16 %v1359_v41  ;;  %v1363_v61 = vunpack.i.h.bf16 %v1359_v41 }
 0x206   :  { %v381_v45 = vpack.c.bf16 %v1360_v58, %v1355_v38 }
 0x208   :  { %1124 = vmatmul.mubr.msk.bf16.gmra.mrb[28].mxu0 %vm418_vm0, %v381_v45  ;;  %1144 = vmatmul.mubr.msk.bf16.gmra.mrb[16].mxu1 %vm418_vm0, %v391_v46 }
 0x209   :  { %1147 = vmatprep.mubr.msk.bf16.mxu1 %vm418_vm0, %v392_v47 }
 0x210   :  { %1148 = vmatmul.mubr.msk.bf16.gmra.mrb[20].mxu1 %vm418_vm0, %v393_v50 }
 0x211   :  { %1151 = vmatprep.mubr.msk.bf16.mxu1 %vm418_vm0, %v394_v51 }
 0x218   :  { %1152 = vmatmul.mubr.msk.bf16.gmra.mrb[24].mxu1 %vm418_vm0, %v395_v29 }
 0x219   :  { %1155 = vmatprep.mubr.msk.bf16.mxu1 %vm418_vm0, %v396_v57 }
 0x220   :  { %1156 = vmatmul.mubr.msk.bf16.gmra.mrb[28].mxu1 %vm418_vm0, %v397_v42 }
 0x221   :  { %1159 = vmatprep.mubr.msk.bf16.mxu1 %vm418_vm0, %v1556_v13  ;;  %v1358_v13 = vunpack.i.h.bf16 %v1354_v34 }
 0x223   :  { %v405_v62 = vpack.c.bf16 %v1363_v61, %v1358_v13 }
 0x228   :  { %1160 = vmatmul.mubr.msk.bf16.gmra.mrb[32].mxu1 %vm418_vm0, %v1566_v26 }
 0x229   :  { %1163 = vmatprep.mubr.msk.bf16.mxu1 %vm418_vm0, %v1576_v39 }
 0x230   :  { %1164 = vmatmul.mubr.msk.bf16.gmra.mrb[36].mxu1 %vm418_vm0, %v1586_v52 }
 0x231   :  { %1167 = vmatprep.mubr.msk.bf16.mxu1 %vm418_vm0, %v1596_v5 }
 0x238   :  { %1168 = vmatmul.mubr.msk.bf16.gmra.mrb[40].mxu1 %vm418_vm0, %v403_v21 }
 0x239   :  { %1171 = vmatprep.mubr.msk.bf16.mxu1 %vm418_vm0, %v404_v60 }
 0x240   :  { %1172 = vmatmul.mubr.msk.bf16.gmra.mrb[44].mxu1 %vm418_vm0, %v405_v62 }
 0x2a3   :  { %v1129_v26 = vpop.f32.mrb[0].mxu1 }
 0x2a4   :  { %v613_v39 = vpop.f32.mrb[1].mxu1 }
 0x2a5   :  { %v1130_v0 = vpop.f32.mrb[2].mxu1  ;;  %836 = vxpose.xlu1.b32.start [1/16] (narrow) %v613_v39, 32 }
 0x2a6   :  { %v616_v52 = vpop.f32.mrb[3].mxu1 }
 0x2a9   :  { %837 = vxpose.xlu1.b32.cont [2/16] (narrow) %v616_v52, 32 }
 0x2ab   :  { %v1113_v1 = vpop.f32.mrb[16].mxu0 }
 0x2ac   :  { %v549_v2 = vpop.f32.mrb[17].mxu0 }
 0x2ad   :  { %838 = vxpose.xlu1.b32.cont [3/16] (narrow) %v1129_v26, 32  ;;  %804 = vxpose.xlu0.b32.start [1/16] (narrow) %v549_v2, 32  ;;  %v1114_v4 = vpop.f32.mrb[18].mxu0 }
 0x2ae   :  { %v552_v5 = vpop.f32.mrb[19].mxu0 }
 0x2b1   :  { %839 = vxpose.xlu1.b32.cont [4/16] (narrow) %v1130_v0, 32  ;;  %805 = vxpose.xlu0.b32.cont [2/16] (narrow) %v552_v5, 32 }
 0x2b3   :  { %v1133_v6 = vpop.f32.mrb[4].mxu1 }
 0x2b4   :  { %v629_v7 = vpop.f32.mrb[5].mxu1 }
 0x2b5   :  { %v1134_v8 = vpop.f32.mrb[6].mxu1  ;;  %840 = vxpose.xlu1.b32.cont [5/16] (narrow) %v629_v7, 32  ;;  %806 = vxpose.xlu0.b32.cont [3/16] (narrow) %v1113_v1, 32 }
 0x2b6   :  { %v632_v9 = vpop.f32.mrb[7].mxu1 }
 0x2b9   :  { %841 = vxpose.xlu1.b32.cont [6/16] (narrow) %v632_v9, 32  ;;  %807 = vxpose.xlu0.b32.cont [4/16] (narrow) %v1114_v4, 32 }
 0x2bb   :  { %v1117_v11 = vpop.f32.mrb[20].mxu0 }
 0x2bc   :  { %v565_v12 = vpop.f32.mrb[21].mxu0 }
 0x2bd   :  { %842 = vxpose.xlu1.b32.cont [7/16] (narrow) %v1133_v6, 32  ;;  %808 = vxpose.xlu0.b32.cont [5/16] (narrow) %v565_v12, 32  ;;  %v1118_v14 = vpop.f32.mrb[22].mxu0 }
 0x2be   :  { %v568_v15 = vpop.f32.mrb[23].mxu0 }
 0x2c1   :  { %843 = vxpose.xlu1.b32.cont [8/16] (narrow) %v1134_v8, 32  ;;  %809 = vxpose.xlu0.b32.cont [6/16] (narrow) %v568_v15, 32 }
 0x2c3   :  { %v1137_v17 = vpop.f32.mrb[8].mxu1 }
 0x2c4   :  { %v645_v18 = vpop.f32.mrb[9].mxu1 }
 0x2c5   :  { %v1138_v19 = vpop.f32.mrb[10].mxu1  ;;  %844 = vxpose.xlu1.b32.cont [9/16] (narrow) %v645_v18, 32  ;;  %810 = vxpose.xlu0.b32.cont [7/16] (narrow) %v1117_v11, 32 }
 0x2c6   :  { %v648_v20 = vpop.f32.mrb[11].mxu1 }
 0x2c9   :  { %845 = vxpose.xlu1.b32.cont [10/16] (narrow) %v648_v20, 32  ;;  %811 = vxpose.xlu0.b32.cont [8/16] (narrow) %v1118_v14, 32 }
 0x2cb   :  { %v1121_v21 = vpop.f32.mrb[24].mxu0 }
 0x2cc   :  { %v581_v22 = vpop.f32.mrb[25].mxu0 }
 0x2cd   :  { %846 = vxpose.xlu1.b32.cont [11/16] (narrow) %v1137_v17, 32  ;;  %812 = vxpose.xlu0.b32.cont [9/16] (narrow) %v581_v22, 32  ;;  %v1122_v23 = vpop.f32.mrb[26].mxu0 }
 0x2ce   :  { %v584_v25 = vpop.f32.mrb[27].mxu0 }
 0x2d1   :  { %847 = vxpose.xlu1.b32.cont [12/16] (narrow) %v1138_v19, 32  ;;  %813 = vxpose.xlu0.b32.cont [10/16] (narrow) %v584_v25, 32 }
 0x2d3   :  { %v1141_v27 = vpop.f32.mrb[12].mxu1 }
 0x2d4   :  { %v661_v28 = vpop.f32.mrb[13].mxu1 }
 0x2d5   :  { %v1142_v30 = vpop.f32.mrb[14].mxu1  ;;  %848 = vxpose.xlu1.b32.cont [13/16] (narrow) %v661_v28, 32  ;;  %814 = vxpose.xlu0.b32.cont [11/16] (narrow) %v1121_v21, 32 }
 0x2d6   :  { %v664_v31 = vpop.f32.mrb[15].mxu1 }
 0x2d9   :  { %849 = vxpose.xlu1.b32.cont [14/16] (narrow) %v664_v31, 32  ;;  %815 = vxpose.xlu0.b32.cont [12/16] (narrow) %v1122_v23, 32 }
 0x2db   :  { %v1125_v32 = vpop.f32.mrb[28].mxu0  ;;  %v1145_v33 = vpop.f32.mrb[16].mxu1 }
 0x2dc   :  { %v597_v34 = vpop.f32.mrb[29].mxu0  ;;  %v677_v35 = vpop.f32.mrb[17].mxu1 }
 0x2dd   :  { %v1146_v37 = vpop.f32.mrb[18].mxu1  ;;  %850 = vxpose.xlu1.b32.cont [15/16] (narrow) %v1141_v27, 32  ;;  %v1126_v59 = vpop.f32.mrb[30].mxu0  ;;  %816 = vxpose.xlu0.b32.cont [13/16] (narrow) %v597_v34, 32 }
 0x2de   :  { %v680_v38 = vpop.f32.mrb[19].mxu1  ;;  %v600_v40 = vpop.f32.mrb[31].mxu0 }
 0x2e1   :  { %851 = vxpose.xlu1.b32.end [16/16] (narrow) %v1142_v30, 32  ;;  %817 = vxpose.xlu0.b32.cont [14/16] (narrow) %v600_v40, 32 }
 0x2e3   :  { %v1149_v41 = vpop.f32.mrb[20].mxu1 }
 0x2e4   :  { %v693_v43 = vpop.f32.mrb[21].mxu1 }
 0x2e5   :  { %v1150_v58 = vpop.f32.mrb[22].mxu1  ;;  %818 = vxpose.xlu0.b32.cont [15/16] (narrow) %v1125_v32, 32 }
 0x2e6   :  { %v696_v44 = vpop.f32.mrb[23].mxu1 }
 0x2e9   :  { %819 = vxpose.xlu0.b32.end [16/16] (narrow) %v1126_v59, 32 }
 0x2eb   :  { %v1153_v45 = vpop.f32.mrb[24].mxu1 }
 0x2ec   :  { %v709_v46 = vpop.f32.mrb[25].mxu1 }
 0x2ed   :  { %v1154_v47 = vpop.f32.mrb[26].mxu1  ;;  %868 = vxpose.xlu0.b32.start [1/16] (narrow) %v677_v35, 32 }
 0x2ee   :  { %v712_v3 = vpop.f32.mrb[27].mxu1 }
 0x2f1   :  { %869 = vxpose.xlu0.b32.cont [2/16] (narrow) %v680_v38, 32 }
 0x2f3   :  { %v1157_v48 = vpop.f32.mrb[28].mxu1 }
 0x2f4   :  { %v725_v16 = vpop.f32.mrb[29].mxu1 }
 0x2f5   :  { %v1158_v63 = vpop.f32.mrb[30].mxu1  ;;  %870 = vxpose.xlu0.b32.cont [3/16] (narrow) %v1145_v33, 32 }
 0x2f6   :  { %v728_v50 = vpop.f32.mrb[31].mxu1 }
 0x2f9   :  { %871 = vxpose.xlu0.b32.cont [4/16] (narrow) %v1146_v37, 32 }
 0x2fb   :  { %v1161_v51 = vpop.f32.mrb[32].mxu1 }
 0x2fc   :  { %v741_v10 = vpop.f32.mrb[33].mxu1 }
 0x2fd   :  { %900 = vxpose.xlu1.b32.start [1/16] (narrow) %v741_v10, 32  ;;  %v1162_v53 = vpop.f32.mrb[34].mxu1  ;;  %872 = vxpose.xlu0.b32.cont [5/16] (narrow) %v693_v43, 32 }
 0x2fe   :  { %v744_v54 = vpop.f32.mrb[35].mxu1 }
 0x301   :  { %901 = vxpose.xlu1.b32.cont [2/16] (narrow) %v744_v54, 32  ;;  %873 = vxpose.xlu0.b32.cont [6/16] (narrow) %v696_v44, 32 }
 0x303   :  { %v1165_v56 = vpop.f32.mrb[36].mxu1 }
 0x304   :  { %v757_v29 = vpop.f32.mrb[37].mxu1 }
 0x305   :  { %902 = vxpose.xlu1.b32.cont [3/16] (narrow) %v1161_v51, 32  ;;  %v1166_v57 = vpop.f32.mrb[38].mxu1  ;;  %874 = vxpose.xlu0.b32.cont [7/16] (narrow) %v1149_v41, 32 }
 0x306   :  { %v760_v24 = vpop.f32.mrb[39].mxu1 }
 0x309   :  { %903 = vxpose.xlu1.b32.cont [4/16] (narrow) %v1162_v53, 32  ;;  %875 = vxpose.xlu0.b32.cont [8/16] (narrow) %v1150_v58, 32 }
 0x30b   :  { %v1169_v36 = vpop.f32.mrb[40].mxu1 }
 0x30c   :  { %v773_v42 = vpop.f32.mrb[41].mxu1 }
 0x30d   :  { %904 = vxpose.xlu1.b32.cont [5/16] (narrow) %v757_v29, 32  ;;  %v1170_v49 = vpop.f32.mrb[42].mxu1  ;;  %876 = vxpose.xlu0.b32.cont [9/16] (narrow) %v709_v46, 32 }
 0x30e   :  { %v776_v55 = vpop.f32.mrb[43].mxu1 }
 0x311   :  { %905 = vxpose.xlu1.b32.cont [6/16] (narrow) %v760_v24, 32  ;;  %877 = vxpose.xlu0.b32.cont [10/16] (narrow) %v712_v3, 32 }
 0x313   :  { %v1173_v60 = vpop.f32.mrb[44].mxu1 }
 0x314   :  { %v789_v13 = vpop.f32.mrb[45].mxu1 }
 0x315   :  { %906 = vxpose.xlu1.b32.cont [7/16] (narrow) %v1165_v56, 32  ;;  %v1174_v61 = vpop.f32.mrb[46].mxu1  ;;  %878 = vxpose.xlu0.b32.cont [11/16] (narrow) %v1153_v45, 32 }
 0x316   :  { %v792_v62 = vpop.f32.mrb[47].mxu1 }
 0x319   :  { %907 = vxpose.xlu1.b32.cont [8/16] (narrow) %v1166_v57, 32  ;;  %879 = vxpose.xlu0.b32.cont [12/16] (narrow) %v1154_v47, 32 }
 0x31d   :  { %908 = vxpose.xlu1.b32.cont [9/16] (narrow) %v773_v42, 32  ;;  %880 = vxpose.xlu0.b32.cont [13/16] (narrow) %v725_v16, 32 }
 0x321   :  { %909 = vxpose.xlu1.b32.cont [10/16] (narrow) %v776_v55, 32  ;;  %881 = vxpose.xlu0.b32.cont [14/16] (narrow) %v728_v50, 32 }
 0x325   :  { %910 = vxpose.xlu1.b32.cont [11/16] (narrow) %v1169_v36, 32  ;;  %v852_v26 = vpop.trf.xlu1  ;;  %882 = vxpose.xlu0.b32.cont [15/16] (narrow) %v1157_v48, 32 }
 0x326   :  { %936 = vst [vmem:[#allocation8 + $0x20] sm:$0xff] %v852_v26  ;;  %v944_v21 = vmul.f32 %v852_v26, %v852_v26 }
 0x329   :  { %911 = vxpose.xlu1.b32.cont [12/16] (narrow) %v1170_v49, 32  ;;  %v853_v39 = vpop.trf.xlu1  ;;  %883 = vxpose.xlu0.b32.end [16/16] (narrow) %v1158_v63, 32 }
 0x32a   :  { %937 = vst [vmem:[#allocation8 + $0x28] sm:$0xff] %v853_v39  ;;  %v945_v25 = vmul.f32 %v853_v39, %v853_v39 }
 0x32d   :  { %912 = vxpose.xlu1.b32.cont [13/16] (narrow) %v789_v13, 32  ;;  %v854_v0 = vpop.trf.xlu1  ;;  %v820_v52 = vpop.trf.xlu0 }
 0x32e   :  { %938 = vst [vmem:[#allocation8 + $0x30] sm:$0xff] %v854_v0  ;;  %932 = vst [vmem:[#allocation8] sm:$0xff] %v820_v52  ;;  %v940_v6 = vmul.f32 %v820_v52, %v820_v52  ;;  %v946_v30 = vmul.f32 %v854_v0, %v854_v0 }
 0x331   :  { %913 = vxpose.xlu1.b32.cont [14/16] (narrow) %v792_v62, 32  ;;  %v855_v1 = vpop.trf.xlu1  ;;  %v821_v2 = vpop.trf.xlu0 }
 0x332   :  { %939 = vst [vmem:[#allocation8 + $0x38] sm:$0xff] %v855_v1  ;;  %933 = vst [vmem:[#allocation8 + $0x8] sm:$0xff] %v821_v2  ;;  %v941_v8 = vmul.f32 %v821_v2, %v821_v2  ;;  %v947_v33 = vmul.f32 %v855_v1, %v855_v1 }
 0x335   :  { %914 = vxpose.xlu1.b32.cont [15/16] (narrow) %v1173_v60, 32  ;;  %v822_v4 = vpop.trf.xlu0 }
 0x336   :  { %934 = vst [vmem:[#allocation8 + $0x10] sm:$0xff] %v822_v4  ;;  %v942_v12 = vmul.f32 %v822_v4, %v822_v4 }
 0x339   :  { %915 = vxpose.xlu1.b32.end [16/16] (narrow) %v1174_v61, 32  ;;  %v823_v5 = vpop.trf.xlu0 }
 0x33a   :  { %935 = vst [vmem:[#allocation8 + $0x18] sm:$0xff] %v823_v5  ;;  %v943_v17 = vmul.f32 %v823_v5, %v823_v5 }
 0x36d   :  { %v884_v7 = vpop.trf.xlu0 }
 0x36e   :  { %v948_v9 = vsub.f32 %v884_v7, %v940_v6 }
 0x370   :  { %957 = vst [vmem:[#allocation8 + $0x40] sm:$0xff] %v948_v9 }
 0x371   :  { %v885_v11 = vpop.trf.xlu0 }
 0x372   :  { %v949_v14 = vsub.f32 %v885_v11, %v941_v8 }
 0x374   :  { %958 = vst [vmem:[#allocation8 + $0x48] sm:$0xff] %v949_v14 }
 0x375   :  { %v886_v15 = vpop.trf.xlu0 }
 0x376   :  { %v950_v18 = vsub.f32 %v886_v15, %v942_v12 }
 0x378   :  { %959 = vst [vmem:[#allocation8 + $0x50] sm:$0xff] %v950_v18 }
 0x379   :  { %v887_v19 = vpop.trf.xlu0 }
 0x37a   :  { %v951_v20 = vsub.f32 %v887_v19, %v943_v17 }
 0x37c   :  { %960 = vst [vmem:[#allocation8 + $0x58] sm:$0xff] %v951_v20 }
 0x37d   :  { %v916_v22 = vpop.trf.xlu1 }
 0x37e   :  { %v952_v23 = vsub.f32 %v916_v22, %v944_v21 }
 0x380   :  { %961 = vst [vmem:[#allocation8 + $0x60] sm:$0xff] %v952_v23 }
 0x381   :  { %v917_v27 = vpop.trf.xlu1 }
 0x382   :  { %v953_v28 = vsub.f32 %v917_v27, %v945_v25 }
 0x384   :  { %962 = vst [vmem:[#allocation8 + $0x68] sm:$0xff] %v953_v28 }
 0x385   :  { %v918_v31 = vpop.trf.xlu1 }
 0x386   :  { %v954_v32 = vsub.f32 %v918_v31, %v946_v30 }
 0x388   :  { %963 = vst [vmem:[#allocation8 + $0x70] sm:$0xff] %v954_v32 }
 0x389   :  { %v919_v34 = vpop.trf.xlu1 }
 0x38a   :  { %v955_v35 = vsub.f32 %v919_v34, %v947_v33 }
 0x38c   :  { %964 = vst [vmem:[#allocation8 + $0x78] sm:$0xff] %v955_v35 }
 0x38d   :  { %1451 = shalt.err (!%p1448_p0)
}
 0x38e   :  { %s1452_s27 = scalar_lea.hbm %s1658_s3, 2048 }
 0x38f   :  { %p1453_p1 = scmp.ne.s32.totalorder %s1658_s3, %s1452_s27  ;;  %p1456_p2 = scmp.lt.u32.totalorder %s1452_s27, %s1658_s3 }
 0x391   :  { %p1458_p3 = pnand %p1456_p2, %p1453_p1 }
 0x393   :  { %1461 = shalt.err (!%p1458_p3)
}
 0x394   :  { %976 = dma.vmem_to_hbm [thread:$0]  %s971_s22, 2048, %s1658_s3, [#allocation4], %s1472_s1, %s1472_s1, %s1473_s9  }
 0x395   :  { %1466 = dma.done.wait [#allocation4], 2048  }
 0x396   :  { %1467 = vsyncadd [#allocation4], 4294965248 }
 0x397   :  { %980 = vsyncpa [#allocation3], 1 }
 0x398   :  { %981 = vsyncpa [#allocation6], 1 }
 0x399   :  { %982 = vsyncpa [#allocation4], 1 }

</bundles_post_ra>
